<compile_context>
chip_gen: v7x
topology: tpu7x:2x2x1
jax: 0.10.0
libtpu: 0.0.40
codegen_flags: <defaults>
</compile_context>

<pallas_src>
import functools

import jax
import jax.numpy as jnp
from jax.experimental import pallas as pl
from jax.experimental.pallas import tpu as pltpu


def _round_up(n: int, m: int) -> int:
    return ((n + m - 1) // m) * m


def _value_kernel(x_ref, w1_ref, b1_ref, w2_ref, b2_ref, w3_ref, b3_ref, o_ref):
    # One batch tile per grid step; weights/biases are VMEM-resident (constant index_map).
    # Matmuls use bf16 operands on the MXU; accumulation / bias-add / ReLU stay f32.
    x = x_ref[...].astype(jnp.bfloat16)

    h1 = jnp.dot(x, w1_ref[...], preferred_element_type=jnp.float32) + b1_ref[...]
    h1 = jnp.maximum(h1, 0.0).astype(jnp.bfloat16)

    h2 = jnp.dot(h1, w2_ref[...], preferred_element_type=jnp.float32) + b2_ref[...]
    h2 = jnp.maximum(h2, 0.0).astype(jnp.bfloat16)

    out = jnp.dot(h2, w3_ref[...], preferred_element_type=jnp.float32) + b3_ref[...]
    o_ref[...] = out.astype(o_ref.dtype)


def prepare_params(raw_params):
    """One-time glue (out of the hot path): transpose PyTorch-style [out,in] weights to
    [in,out], cast to bf16, reshape biases to [1,out] (kept f32), and zero-pad every
    feature dim up to a multiple of 128 so the kernel is lane-dense. Zero padding is
    exact: padded hidden columns get bias 0 -> ReLU(0)=0 and the matching padded weight
    rows of the next layer are 0; padded output columns are sliced off in the wrapper.

    Returns (packed_params, sizes); `sizes` are plain python ints kept OUT of the jitted
    argument tree so all slicing stays static."""

    def pack(w, b):
        out_f, in_f = w.shape
        in_p = _round_up(in_f, 128)
        out_p = _round_up(out_f, 128)
        wt = (jnp.zeros((in_p, out_p), jnp.bfloat16)
              .at[:in_f, :out_f].set(w.T.astype(jnp.bfloat16)))
        br = jnp.zeros((1, out_p), jnp.float32).at[0, :out_f].set(b)
        return wt, br

    packed = {
        "fc1": pack(*raw_params["fc1"]),
        "fc2": pack(*raw_params["fc2"]),
        "fc3": pack(*raw_params["fc3"]),
    }
    sizes = {
        "input": int(raw_params["fc1"][0].shape[1]),
        "hidden": int(raw_params["fc2"][0].shape[1]),
        "output": int(raw_params["fc3"][0].shape[0]),
    }
    return packed, sizes


def _const_spec(shape):
    # Resident weights/biases: constant index_map -> same block every grid step, so
    # double-buffering buys nothing. Single-buffer to halve resident VMEM (v7x: 64 MiB).
    index_map = lambda i: (0,) * len(shape)
    try:
        return pl.BlockSpec(shape, index_map, pipeline_mode=pl.Buffered(1))
    except (TypeError, ValueError):  # fall back to default buffering on older signatures
        return pl.BlockSpec(shape, index_map)


@functools.partial(jax.jit, static_argnames=("out_size", "block_b"))
def value_network_forward(x, kparams, out_size: int, block_b: int = 512):
    """x: [B, input_size] float32. kparams: packed dict from prepare_params.
    out_size: static python int (true output width before lane padding)."""
    w1t, b1r = kparams["fc1"]
    w2t, b2r = kparams["fc2"]
    w3t, b3r = kparams["fc3"]

    B, in_size = x.shape
    in_p = w1t.shape[0]
    h_p = w1t.shape[1]
    out_p = w3t.shape[1]

    # Zero-pad ONLY the feature dim (so padded lanes can't leak garbage into fc1);
    # no-op when input_size is already a multiple of 128. Batch is NOT padded.
    if in_size != in_p:
        x = jnp.pad(x, ((0, 0), (0, in_p - in_size)))

    # Batch tile: multiple of 8 sublanes, fat enough to amortize per-step overhead
    # (stays >=256 for large B on 256-wide MXU parts), but capped at ceil(B/2) so batches
    # that would fit a single tile still produce >=2 grid steps (both v7x TCs busy).
    bm = min(block_b, _round_up(max((B + 1) // 2, 1), 8))
    grid_b = pl.cdiv(B, bm)

    rows = grid_b * bm  # includes ragged-tile rows that are actually computed
    flops = 2 * rows * (in_p * h_p + h_p * h_p + h_p * out_p)
    bytes_accessed = (
        rows * (in_p + out_p) * 4                          # streamed x / out (f32)
        + (in_p * h_p + h_p * h_p + h_p * out_p) * 2       # bf16 weights
        + (2 * h_p + out_p) * 4                            # f32 biases
    )

    # VMEM budget: single-buffered bf16 weights + f32 biases + double-buffered x/out
    # tiles + slack; clamped to stay sane across v5e/v6e/v7x scoped limits.
    weight_bytes = (in_p * h_p + h_p * h_p + h_p * out_p) * 2
    bias_bytes = (2 * h_p + out_p) * 4
    stream_bytes = 2 * bm * (in_p + out_p) * 4
    need = 2 * weight_bytes + 2 * bias_bytes + stream_bytes + (4 << 20)
    vmem_limit = int(min(max(need, 16 << 20), 100 << 20))

    out = pl.pallas_call(
        _value_kernel,
        out_shape=jax.ShapeDtypeStruct((B, out_p), jnp.float32),
        grid=(grid_b,),
        in_specs=[
            pl.BlockSpec((bm, in_p), lambda i: (i, 0)),      # streamed x tiles
            _const_spec(w1t.shape), _const_spec(b1r.shape),  # resident weights/biases
            _const_spec(w2t.shape), _const_spec(b2r.shape),
            _const_spec(w3t.shape), _const_spec(b3r.shape),
        ],
        out_specs=pl.BlockSpec((bm, out_p), lambda i: (i, 0)),
        compiler_params=pltpu.CompilerParams(
            dimension_semantics=("parallel",),   # batch tiles shard across v7x's 2 TCs
            vmem_limit_bytes=vmem_limit,
        ),
        cost_estimate=pl.CostEstimate(
            flops=flops, transcendentals=0, bytes_accessed=bytes_accessed
        ),
    )(x, w1t, b1r, w2t, b2r, w3t, b3r)

    # Lane-dense out_spec kept (unmasked vst); slice back the true value-head columns.
    return out[:, :out_size]


def init_params(key, input_size, hidden_size, output_size):
    """PyTorch nn.Linear-style init: U(-1/sqrt(fan_in), 1/sqrt(fan_in)). Raw (unpadded)."""
    def linear(k, fan_in, fan_out):
        kw, kb = jax.random.split(k)
        bound = 1.0 / jnp.sqrt(fan_in)
        w = jax.random.uniform(kw, (fan_out, fan_in), jnp.float32, -bound, bound)
        b = jax.random.uniform(kb, (fan_out,), jnp.float32, -bound, bound)
        return w, b

    k1, k2, k3 = jax.random.split(key, 3)
    return {
        "fc1": linear(k1, input_size, hidden_size),
        "fc2": linear(k2, hidden_size, hidden_size),
        "fc3": linear(k3, hidden_size, output_size),
    }


if __name__ == "__main__":
    batch = 2
    input_size = 16
    hidden_size = 32
    output_size = 4

    key = jax.random.PRNGKey(0)
    kx, kp = jax.random.split(key)

    x = jax.random.normal(kx, (batch, input_size), jnp.float32)
    raw_params = init_params(kp, input_size, hidden_size, output_size)
    kparams, sizes = prepare_params(raw_params)   # one-time transpose/pad/bf16 cast

    out = value_network_forward(x, kparams, out_size=sizes["output"])
    out = jax.block_until_ready(out)
    assert out.shape == (batch, output_size)

    # Reference in plain f32 JAX (same math as the PyTorch ValueNetwork).
    w1, b1 = raw_params["fc1"]
    w2, b2 = raw_params["fc2"]
    w3, b3 = raw_params["fc3"]
    h = jnp.maximum(x @ w1.T + b1, 0.0)
    h = jnp.maximum(h @ w2.T + b2, 0.0)
    ref = h @ w3.T + b3
    # bf16 MXU operands -> relaxed tolerance vs the f32 reference.
    assert jnp.allclose(out, ref, rtol=2e-2, atol=2e-2), "mismatch vs reference"

    print("KERNEL_OK")
</pallas_src>

<mosaic_0001>
module attributes {stable_mosaic.version = 11 : i64} {
  func.func @_value_kernel(%arg0: i32, %arg1: memref<8x128xf32, #tpu.memory_space<vmem>>, %arg2: memref<128x128xbf16, #tpu.memory_space<vmem>>, %arg3: memref<1x128xf32, #tpu.memory_space<vmem>>, %arg4: memref<128x128xbf16, #tpu.memory_space<vmem>>, %arg5: memref<1x128xf32, #tpu.memory_space<vmem>>, %arg6: memref<128x128xbf16, #tpu.memory_space<vmem>>, %arg7: memref<1x128xf32, #tpu.memory_space<vmem>>, %arg8: memref<8x128xf32, #tpu.memory_space<vmem>>) attributes {dimension_semantics = [#tpu.dimension_semantics<parallel>], iteration_bounds = array<i64: 1>, scalar_prefetch = 0 : i64, scratch_operands = 0 : i64, tpu.core_type = #tpu.core_type<tc>, window_params = [{transform_indices = @transform_0, window_bounds = array<i64: 8, 128>}, {pipeline_mode = #tpu.pipeline_mode<synchronous>, transform_indices = @transform_1, window_bounds = array<i64: 128, 128>}, {pipeline_mode = #tpu.pipeline_mode<synchronous>, transform_indices = @transform_2, window_bounds = array<i64: 1, 128>}, {pipeline_mode = #tpu.pipeline_mode<synchronous>, transform_indices = @transform_3, window_bounds = array<i64: 128, 128>}, {pipeline_mode = #tpu.pipeline_mode<synchronous>, transform_indices = @transform_4, window_bounds = array<i64: 1, 128>}, {pipeline_mode = #tpu.pipeline_mode<synchronous>, transform_indices = @transform_5, window_bounds = array<i64: 128, 128>}, {pipeline_mode = #tpu.pipeline_mode<synchronous>, transform_indices = @transform_6, window_bounds = array<i64: 1, 128>}, {transform_indices = @transform_7, window_bounds = array<i64: 8, 128>}]} {
    %c0 = arith.constant 0 : index
    %c0_0 = arith.constant 0 : index
    %0 = vector.load %arg1[%c0, %c0_0] : memref<8x128xf32, #tpu.memory_space<vmem>>, vector<8x128xf32>
    %1 = arith.truncf %0 : vector<8x128xf32> to vector<8x128xbf16>
    %c0_1 = arith.constant 0 : index
    %c0_2 = arith.constant 0 : index
    %2 = vector.load %arg2[%c0_1, %c0_2] : memref<128x128xbf16, #tpu.memory_space<vmem>>, vector<128x128xbf16>
    %cst = arith.constant dense<0.000000e+00> : vector<8x128xf32>
    %3 = tpu.matmul %1, %2, %cst {dimension_numbers = #tpu.dot_dimension_numbers<[1], [0], [0], [1], [0, 0, 1, 1], [], []>} : vector<8x128xbf16>, vector<128x128xbf16>, vector<8x128xf32> -> vector<8x128xf32>
    %c0_3 = arith.constant 0 : index
    %c0_4 = arith.constant 0 : index
    %4 = vector.load %arg3[%c0_3, %c0_4] : memref<1x128xf32, #tpu.memory_space<vmem>>, vector<1x128xf32>
    %5 = vector.broadcast %4 : vector<1x128xf32> to vector<8x128xf32>
    %6 = arith.addf %3, %5 : vector<8x128xf32>
    %cst_5 = arith.constant 0.000000e+00 : f32
    %7 = vector.broadcast %cst_5 : f32 to vector<8x128xf32>
    %8 = arith.maximumf %6, %7 : vector<8x128xf32>
    %9 = arith.truncf %8 : vector<8x128xf32> to vector<8x128xbf16>
    %c0_6 = arith.constant 0 : index
    %c0_7 = arith.constant 0 : index
    %10 = vector.load %arg4[%c0_6, %c0_7] : memref<128x128xbf16, #tpu.memory_space<vmem>>, vector<128x128xbf16>
    %cst_8 = arith.constant dense<0.000000e+00> : vector<8x128xf32>
    %11 = tpu.matmul %9, %10, %cst_8 {dimension_numbers = #tpu.dot_dimension_numbers<[1], [0], [0], [1], [0, 0, 1, 1], [], []>} : vector<8x128xbf16>, vector<128x128xbf16>, vector<8x128xf32> -> vector<8x128xf32>
    %c0_9 = arith.constant 0 : index
    %c0_10 = arith.constant 0 : index
    %12 = vector.load %arg5[%c0_9, %c0_10] : memref<1x128xf32, #tpu.memory_space<vmem>>, vector<1x128xf32>
    %13 = vector.broadcast %12 : vector<1x128xf32> to vector<8x128xf32>
    %14 = arith.addf %11, %13 : vector<8x128xf32>
    %cst_11 = arith.constant 0.000000e+00 : f32
    %15 = vector.broadcast %cst_11 : f32 to vector<8x128xf32>
    %16 = arith.maximumf %14, %15 : vector<8x128xf32>
    %17 = arith.truncf %16 : vector<8x128xf32> to vector<8x128xbf16>
    %c0_12 = arith.constant 0 : index
    %c0_13 = arith.constant 0 : index
    %18 = vector.load %arg6[%c0_12, %c0_13] : memref<128x128xbf16, #tpu.memory_space<vmem>>, vector<128x128xbf16>
    %cst_14 = arith.constant dense<0.000000e+00> : vector<8x128xf32>
    %19 = tpu.matmul %17, %18, %cst_14 {dimension_numbers = #tpu.dot_dimension_numbers<[1], [0], [0], [1], [0, 0, 1, 1], [], []>} : vector<8x128xbf16>, vector<128x128xbf16>, vector<8x128xf32> -> vector<8x128xf32>
    %c0_15 = arith.constant 0 : index
    %c0_16 = arith.constant 0 : index
    %20 = vector.load %arg7[%c0_15, %c0_16] : memref<1x128xf32, #tpu.memory_space<vmem>>, vector<1x128xf32>
    %21 = vector.broadcast %20 : vector<1x128xf32> to vector<8x128xf32>
    %22 = arith.addf %19, %21 : vector<8x128xf32>
    %c0_17 = arith.constant 0 : index
    %c0_18 = arith.constant 0 : index
    %23 = vector.load %arg8[%c0_17, %c0_18] : memref<8x128xf32, #tpu.memory_space<vmem>>, vector<8x128xf32>
    tpu.vector_store %arg8[%c0_17, %c0_18], %22 {strides = array<i32>} : memref<8x128xf32, #tpu.memory_space<vmem>>, vector<8x128xf32>,
    return
  }
  func.func @transform_0(%arg0: i32) -> (i32, i32) {
    %c0_i32 = arith.constant 0 : i32
    %c0_i32_0 = arith.constant 0 : i32
    return %arg0, %c0_i32 : i32, i32
  }
  func.func @transform_1(%arg0: i32) -> (i32, i32) {
    %c0_i32 = arith.constant 0 : i32
    %c0_i32_0 = arith.constant 0 : i32
    %c0_i32_1 = arith.constant 0 : i32
    return %c0_i32, %c0_i32_0 : i32, i32
  }
  func.func @transform_2(%arg0: i32) -> (i32, i32) {
    %c0_i32 = arith.constant 0 : i32
    %c0_i32_0 = arith.constant 0 : i32
    %c0_i32_1 = arith.constant 0 : i32
    return %c0_i32, %c0_i32_0 : i32, i32
  }
  func.func @transform_3(%arg0: i32) -> (i32, i32) {
    %c0_i32 = arith.constant 0 : i32
    %c0_i32_0 = arith.constant 0 : i32
    %c0_i32_1 = arith.constant 0 : i32
    return %c0_i32, %c0_i32_0 : i32, i32
  }
  func.func @transform_4(%arg0: i32) -> (i32, i32) {
    %c0_i32 = arith.constant 0 : i32
    %c0_i32_0 = arith.constant 0 : i32
    %c0_i32_1 = arith.constant 0 : i32
    return %c0_i32, %c0_i32_0 : i32, i32
  }
  func.func @transform_5(%arg0: i32) -> (i32, i32) {
    %c0_i32 = arith.constant 0 : i32
    %c0_i32_0 = arith.constant 0 : i32
    %c0_i32_1 = arith.constant 0 : i32
    return %c0_i32, %c0_i32_0 : i32, i32
  }
  func.func @transform_6(%arg0: i32) -> (i32, i32) {
    %c0_i32 = arith.constant 0 : i32
    %c0_i32_0 = arith.constant 0 : i32
    %c0_i32_1 = arith.constant 0 : i32
    return %c0_i32, %c0_i32_0 : i32, i32
  }
  func.func @transform_7(%arg0: i32) -> (i32, i32) {
    %c0_i32 = arith.constant 0 : i32
    %c0_i32_0 = arith.constant 0 : i32
    return %arg0, %c0_i32 : i32, i32
  }
}

</mosaic_0001>

<bundles_post_ra>
// kernel: value_network_forward.1
= control target key start
LH: loop header
LB: loop body
LE: loop exit
PB: predicated region body
PF: predicated region fallthrough
CT: control target
= control target key end

     0   :  { %12 = vsyncpa [#allocation3], 0  ;;  %s825_s0 = inlined_call_operand.vmem [shape: f32[2,128], index: 0, kind: input, shape index: {}]   ;;  %s826_s1 = inlined_call_operand.hbm [shape: bf16[128,128], index: 1, kind: input, shape index: {}]   ;;  %s827_s2 = inlined_call_operand.vmem [shape: f32[1,128], index: 2, kind: input, shape index: {}]   ;;  %s828_s3 = inlined_call_operand.hbm [shape: bf16[128,128], index: 3, kind: input, shape index: {}]   ;;  %s829_s4 = inlined_call_operand.vmem [shape: f32[1,128], index: 4, kind: input, shape index: {}]   ;;  %s830_s5 = inlined_call_operand.hbm [shape: bf16[128,128], index: 5, kind: input, shape index: {}]   ;;  %s831_s6 = inlined_call_operand.vmem [shape: f32[1,128], index: 6, kind: input, shape index: {}]   ;;  %s832_s7 = inlined_call_operand.hbm [shape: f32[2,128], index: 7, kind: output, shape index: {}]  }
   0x1   :  { %13 = vsyncpa [#allocation6], 0 }
   0x2   :  { %14 = vsyncpa [#allocation4], 0  ;;  %s669_s24 = smov [#allocation5]   ;;  %s670_s26 = smov [#allocation2]  }
   0x3   :  { %s36_s25 = sshll.u32 %s669_s24, 4  ;;  %s22_s27 = sshll.u32 %s670_s26, 4  ;;  %s37_s25 = int_to_ptr.vmem [resolvable:$true] %s36_s25  ;;  %s719_s27 = int_to_ptr.vmem [resolvable:$true] %s22_s27 }
   0x4   :  { %s575_s30 = scalar_lea.hbm %s828_s3, 1024 }
   0x5   :  { %p576_p0 = scmp.ne.s32.totalorder %s828_s3, %s575_s30  ;;  %p579_p1 = scmp.lt.u32.totalorder %s575_s30, %s828_s3 }
   0x7   :  { %p581_p2 = pnand %p579_p1, %p576_p0 }
   0x9   :  { %584 = shalt.err (!%p581_p2)
}
   0xa   :  { %s585_s12 = scalar_lea.vmem %s37_s25, 1024  ;;  %p590_p4 = scmp.lt.s32.totalorder %s37_s25, %s37_s25 }
   0xb   :  { %p586_p3 = scmp.ne.s32.totalorder %s37_s25, %s585_s12  ;;  %p591_p5 = scmp.lt.s32.totalorder %s585_s12, %s585_s12 }
   0xd   :  { %p592_p6 = por %p591_p5, %p590_p4 }
   0xf   :  { %p593_p7 = pnand %p592_p6, %p586_p3 }
  0x11   :  { %596 = shalt.err (!%p593_p7)
}
  0x12   :  { %s671_s13 = smov 64   ;;  %s672_s14 = smov 4  }
  0x13   :  { %42 = dma.hbm_to_vmem [thread:$0]  %s828_s3, 1024, %s37_s25, [#allocation6], %s671_s13, %s671_s13, %s672_s14  }
  0x14   :  { %s597_s19 = scalar_lea.hbm %s826_s1, 1024 }
  0x15   :  { %p598_p8 = scmp.ne.s32.totalorder %s826_s1, %s597_s19  ;;  %p601_p9 = scmp.lt.u32.totalorder %s597_s19, %s826_s1 }
  0x17   :  { %p603_p10 = pnand %p601_p9, %p598_p8 }
  0x19   :  { %606 = shalt.err (!%p603_p10)
}
  0x1a   :  { %s607_s24 = scalar_lea.vmem %s719_s27, 1024  ;;  %p612_p12 = scmp.lt.s32.totalorder %s719_s27, %s719_s27 }
  0x1b   :  { %p608_p11 = scmp.ne.s32.totalorder %s719_s27, %s607_s24  ;;  %p613_p13 = scmp.lt.s32.totalorder %s607_s24, %s607_s24 }
  0x1d   :  { %p614_p0 = por %p613_p13, %p612_p12 }
  0x1f   :  { %p615_p1 = pnand %p614_p0, %p608_p11 }
  0x21   :  { %618 = shalt.err (!%p615_p1)
}
  0x22   :  { %28 = dma.hbm_to_vmem [thread:$0]  %s826_s1, 1024, %s719_s27, [#allocation3], %s671_s13, %s671_s13, %s672_s14  }
  0x23   :  { %s673_s26 = smov [#allocation7]   ;;  %s619_s8 = scalar_lea.hbm %s830_s5, 1024 }
  0x24   :  { %s50_s28 = sshll.u32 %s673_s26, 4  ;;  %p620_p2 = scmp.ne.s32.totalorder %s830_s5, %s619_s8  ;;  %s51_s28 = int_to_ptr.vmem [resolvable:$true] %s50_s28 }
  0x25   :  { %p623_p3 = scmp.lt.u32.totalorder %s619_s8, %s830_s5 }
  0x27   :  { %p625_p4 = pnand %p623_p3, %p620_p2 }
  0x29   :  { %628 = shalt.err (!%p625_p4)
}
  0x2a   :  { %s629_s15 = scalar_lea.vmem %s51_s28, 1024  ;;  %p634_p6 = scmp.lt.s32.totalorder %s51_s28, %s51_s28 }
  0x2b   :  { %p630_p5 = scmp.ne.s32.totalorder %s51_s28, %s629_s15  ;;  %p635_p7 = scmp.lt.s32.totalorder %s629_s15, %s629_s15 }
  0x2d   :  { %p636_p8 = por %p635_p7, %p634_p6 }
  0x2f   :  { %p637_p9 = pnand %p636_p8, %p630_p5 }
  0x31   :  { %640 = shalt.err (!%p637_p9)
}
  0x32   :  { %56 = dma.hbm_to_vmem [thread:$0]  %s830_s5, 1024, %s51_s28, [#allocation6], %s671_s13, %s671_s13, %s672_s14  }
  0x33   :  { %663 = dma.done.wait [#allocation3], 1024  }
  0x34   :  { %664 = vsyncadd [#allocation3], 4294966272 }
  0x35   :  { %665 = dma.done.wait [#allocation6], 2048  }
  0x36   :  { %666 = vsyncadd [#allocation6], 4294965248  ;;  %v674_v0 = vmov 0.0   ;;  %vm675_vm0 = vmmov 0   ;;  %v551_v1 = vld [vmem:[#allocation2] sm:$0xff]   ;;  %v552_v2 = vld [vmem:[#allocation2 + $0x8] sm:$0xff]  }
  0x37   :  { %481 = vmatprep.subr.bf16.mxu0 %v674_v0  ;;  %497 = vmatprep.mubr.msk.bf16.mxu0 %vm675_vm0, %v674_v0  ;;  %v553_v3 = vld [vmem:[#allocation2 + $0x10] sm:$0xff]   ;;  %v559_v4 = vld [vmem:[#allocation5] sm:$0xff]   ;;  %v554_v5 = vld [vmem:[#allocation2 + $0x18] sm:$0xff]  }
  0x38   :  { %501 = vmatprep.subr.bf16.mxu1 %v674_v0  ;;  %517 = vmatprep.mubr.msk.bf16.mxu1 %vm675_vm0, %v674_v0  ;;  %v560_v6 = vld [vmem:[#allocation5 + $0x8] sm:$0xff]   ;;  %v555_v7 = vld [vmem:[#allocation2 + $0x20] sm:$0xff]   ;;  %v561_v8 = vld [vmem:[#allocation5 + $0x10] sm:$0xff]  }
  0x39   :  { %482 = vmatpush3.bf16.msra.mxu0 %v551_v1  ;;  %502 = vmatpush3.bf16.msra.mxu1 %v559_v4  ;;  %v556_v9 = vld [vmem:[#allocation2 + $0x28] sm:$0xff]   ;;  %v562_v10 = vld [vmem:[#allocation5 + $0x18] sm:$0xff]   ;;  %v557_v11 = vld [vmem:[#allocation2 + $0x30] sm:$0xff]  }
  0x3a   :  { %483 = vmatprep.subr.bf16.mxu0 %v674_v0  ;;  %503 = vmatprep.subr.bf16.mxu1 %v674_v0  ;;  %v563_v12 = vld [vmem:[#allocation5 + $0x20] sm:$0xff]   ;;  %v558_v13 = vld [vmem:[#allocation2 + $0x38] sm:$0xff]   ;;  %v564_v15 = vld [vmem:[#allocation5 + $0x28] sm:$0xff]  }
  0x3b   :  { %v69_v14 = vld [vmem:[%s825_s0] sm:$0xff]  ;;  %v565_v17 = vld [vmem:[#allocation5 + $0x30] sm:$0xff]   ;;  %v566_v18 = vld [vmem:[#allocation5 + $0x38] sm:$0xff]  }
  0x3c   :  { %v70_v16 = vpack.c.bf16 %v69_v14, %v69_v14  ;;  %v567_v19 = vld [vmem:[#allocation7] sm:$0xff]   ;;  %v568_v20 = vld [vmem:[#allocation7 + $0x8] sm:$0xff]   ;;  %v569_v21 = vld [vmem:[#allocation7 + $0x10] sm:$0xff]  }
  0x3d   :  { %484 = vmatpush3.bf16.msra.mxu0 %v552_v2  ;;  %504 = vmatpush3.bf16.msra.mxu1 %v560_v6  ;;  %v570_v22 = vld [vmem:[#allocation7 + $0x18] sm:$0xff]   ;;  %v571_v23 = vld [vmem:[#allocation7 + $0x20] sm:$0xff]   ;;  %v572_v24 = vld [vmem:[#allocation7 + $0x28] sm:$0xff]  }
  0x3e   :  { %485 = vmatprep.subr.bf16.mxu0 %v674_v0  ;;  %505 = vmatprep.subr.bf16.mxu1 %v674_v0  ;;  %v427_v25 = vld [vmem:[%s827_s2] ss:$0 sm:$0xff]  ;;  %v573_v33 = vld [vmem:[#allocation7 + $0x30] sm:$0xff]   ;;  %v574_v34 = vld [vmem:[#allocation7 + $0x38] sm:$0xff]  }
  0x3f   :  { %v436_v35 = vld [vmem:[%s829_s4] ss:$0 sm:$0xff] }
  0x40   :  { %v445_v43 = vld [vmem:[%s831_s6] ss:$0 sm:$0xff] }
  0x41   :  { %486 = vmatpush3.bf16.msra.mxu0 %v553_v3  ;;  %506 = vmatpush3.bf16.msra.mxu1 %v561_v8 }
  0x42   :  { %487 = vmatprep.subr.bf16.mxu0 %v674_v0  ;;  %507 = vmatprep.subr.bf16.mxu1 %v674_v0 }
  0x45   :  { %488 = vmatpush3.bf16.msra.mxu0 %v554_v5  ;;  %508 = vmatpush3.bf16.msra.mxu1 %v562_v10 }
  0x46   :  { %489 = vmatprep.subr.bf16.mxu0 %v674_v0  ;;  %509 = vmatprep.subr.bf16.mxu1 %v674_v0 }
  0x49   :  { %490 = vmatpush3.bf16.msra.mxu0 %v555_v7  ;;  %510 = vmatpush3.bf16.msra.mxu1 %v563_v12 }
  0x4a   :  { %491 = vmatprep.subr.bf16.mxu0 %v674_v0  ;;  %511 = vmatprep.subr.bf16.mxu1 %v674_v0 }
  0x4d   :  { %492 = vmatpush3.bf16.msra.mxu0 %v556_v9  ;;  %512 = vmatpush3.bf16.msra.mxu1 %v564_v15 }
  0x4e   :  { %493 = vmatprep.subr.bf16.mxu0 %v674_v0  ;;  %513 = vmatprep.subr.bf16.mxu1 %v674_v0 }
  0x51   :  { %494 = vmatpush3.bf16.msra.mxu0 %v557_v11  ;;  %514 = vmatpush3.bf16.msra.mxu1 %v565_v17 }
  0x52   :  { %495 = vmatprep.subr.bf16.mxu0 %v674_v0  ;;  %515 = vmatprep.subr.bf16.mxu1 %v674_v0 }
  0x55   :  { %496 = vmatpush3.bf16.msra.mxu0 %v558_v13  ;;  %516 = vmatpush3.bf16.msra.mxu1 %v566_v18 }
  0x56   :  { %521 = vmatprep.subr.bf16.mxu0 %v674_v0 }
  0x58   :  { %498 = vmatmul.mubr.bf16.vlgmr.msra.gmra.mrb[0].mxu0 %v70_v16 }
  0x59   :  { %537 = vmatprep.mubr.msk.bf16.mxu0 %vm675_vm0, %v674_v0  ;;  %522 = vmatpush3.bf16.msra.mxu0 %v567_v19 }
  0x5a   :  { %523 = vmatprep.subr.bf16.mxu0 %v674_v0 }
  0x5d   :  { %524 = vmatpush3.bf16.msra.mxu0 %v568_v20 }
  0x5e   :  { %525 = vmatprep.subr.bf16.mxu0 %v674_v0 }
  0x61   :  { %526 = vmatpush3.bf16.msra.mxu0 %v569_v21 }
  0x62   :  { %527 = vmatprep.subr.bf16.mxu0 %v674_v0 }
  0x65   :  { %528 = vmatpush3.bf16.msra.mxu0 %v570_v22 }
  0x66   :  { %529 = vmatprep.subr.bf16.mxu0 %v674_v0 }
  0x69   :  { %530 = vmatpush3.bf16.msra.mxu0 %v571_v23 }
  0x6a   :  { %531 = vmatprep.subr.bf16.mxu0 %v674_v0 }
  0x6d   :  { %532 = vmatpush3.bf16.msra.mxu0 %v572_v24 }
  0x6e   :  { %533 = vmatprep.subr.bf16.mxu0 %v674_v0 }
  0x71   :  { %534 = vmatpush3.bf16.msra.mxu0 %v573_v33 }
  0x72   :  { %535 = vmatprep.subr.bf16.mxu0 %v674_v0 }
  0x75   :  { %536 = vmatpush3.bf16.msra.mxu0 %v574_v34 }
 0x12b   :  { %v176_v26 = vpop.f32.mrb[0].mxu0 }
 0x12c   :  { %v177_v27 = vadd.f32 %v427_v25, %v176_v26  ;;  %v499_v28 = vpop.f32.mrb[1].mxu0 }
 0x12d   :  { %v179_v29 = vpop.f32.mrb[2].mxu0 }
 0x12e   :  { %v182_v30 = vmax.f32 %v177_v27, 0.0  ;;  %v500_v31 = vpop.f32.mrb[3].mxu0 }
 0x130   :  { %v183_v32 = vpack.c.bf16 %v182_v30, %v182_v30 }
 0x132   :  { %518 = vmatmul.mubr.bf16.vlgmr.msra.gmra.mrb[0].mxu1 %v183_v32 }
 0x205   :  { %v289_v36 = vpop.f32.mrb[0].mxu1 }
 0x206   :  { %v290_v37 = vadd.f32 %v436_v35, %v289_v36  ;;  %v519_v38 = vpop.f32.mrb[1].mxu1 }
 0x207   :  { %v292_v39 = vpop.f32.mrb[2].mxu1 }
 0x208   :  { %v295_v40 = vmax.f32 %v290_v37, 0.0  ;;  %v520_v41 = vpop.f32.mrb[3].mxu1 }
 0x20a   :  { %v296_v42 = vpack.c.bf16 %v295_v40, %v295_v40 }
 0x20c   :  { %538 = vmatmul.mubr.bf16.vlgmr.msra.gmra.mrb[4].mxu0 %v296_v42 }
 0x2df   :  { %v402_v44 = vpop.f32.mrb[4].mxu0 }
 0x2e0   :  { %v403_v45 = vadd.f32 %v445_v43, %v402_v44  ;;  %v539_v46 = vpop.f32.mrb[5].mxu0 }
 0x2e1   :  { %v405_v47 = vpop.f32.mrb[6].mxu0 }
 0x2e2   :  { %408 = vst [vmem:[#allocation8] sm:$0xff] %v403_v45  ;;  %v540_v48 = vpop.f32.mrb[7].mxu0 }
 0x2e3   :  { %413 = vsyncadd [#allocation4], 96  ;;  %s676_s4 = smov [#allocation8]  }
 0x2e4   :  { %s414_s19 = sshll.u32 %s676_s4, 4  ;;  %s415_s19 = int_to_ptr.vmem [resolvable:$true] %s414_s19 }
 0x2e5   :  { %s641_s20 = scalar_lea.vmem %s415_s19, 32  ;;  %s645_s21 = scalar_lea.vmem %s415_s19, 128 }
 0x2e6   :  { %p642_p10 = scmp.ne.s32.totalorder %s415_s19, %s641_s20  ;;  %p646_p11 = scmp.lt.s32.totalorder %s415_s19, %s415_s19 }
 0x2e7   :  { %p647_p12 = scmp.lt.s32.totalorder %s645_s21, %s641_s20 }
 0x2e9   :  { %p648_p13 = por %p647_p12, %p646_p11 }
 0x2eb   :  { %p649_p0 = pnand %p648_p13, %p642_p10 }
 0x2ed   :  { %652 = shalt.err (!%p649_p0)
}
 0x2ee   :  { %s653_s23 = scalar_lea.hbm %s832_s7, 32 }
 0x2ef   :  { %p654_p1 = scmp.ne.s32.totalorder %s832_s7, %s653_s23  ;;  %p657_p2 = scmp.lt.u32.totalorder %s653_s23, %s832_s7 }
 0x2f1   :  { %p659_p3 = pnand %p657_p2, %p654_p1 }
 0x2f3   :  { %662 = shalt.err (!%p659_p3)
}
 0x2f4   :  { %s677_s28 = smov 32   ;;  %s678_s29 = smov 2  }
 0x2f5   :  { %420 = dma.vmem_to_hbm [thread:$0]  %s415_s19, 32, %s832_s7, [#allocation4], %s677_s28, %s677_s28, %s678_s29  }
 0x2f6   :  { %667 = dma.done.wait [#allocation4], 128  }
 0x2f7   :  { %668 = vsyncadd [#allocation4], 4294967168 }
 0x2f8   :  { %424 = vsyncpa [#allocation3], 1 }
 0x2f9   :  { %425 = vsyncpa [#allocation6], 1 }
 0x2fa   :  { %426 = vsyncpa [#allocation4], 1 }

</bundles_post_ra>
